<compile_context>
chip_gen: v7x
topology: tpu7x:2x2x1
jax: 0.10.0
libtpu: 0.0.40
codegen_flags: <defaults>
</compile_context>

<pallas_src>
import functools

import jax
import jax.numpy as jnp
from jax.experimental import pallas as pl
from jax.experimental.pallas import tpu as pltpu

LEAKY_SLOPE = 0.01       # torch.nn.functional.leaky_relu default
LOG_STD_LOW = -5.0       # amago TanhGaussian defaults
LOG_STD_HIGH = 2.0


def _actor_kernel(x_ref, w1_ref, b1_ref, w2_ref, b2_ref, w3_ref, b3_ref,
                  out_ref, *, ga):
    """MLP (2 hidden layers, leaky_relu) + fused TanhGaussian param transform.

    x_ref is f32 (cast to bf16 here, hidden under the matmul); w*_ref are bf16
    (MXU inputs); biases and all elementwise math are f32 (v5e has no bf16 VPU/EUP).
    out_ref columns: [mu (ga cols) | std (ga cols)].
    """
    x = x_ref[...].astype(jnp.bfloat16)                               # (tile, D)

    # layer 1: Linear(D -> H) + leaky_relu   (dropout_p = 0.0 -> no-op)
    h = jnp.dot(x, w1_ref[...], preferred_element_type=jnp.float32) + b1_ref[...]
    h = jnp.maximum(h, LEAKY_SLOPE * h)

    # layer 2: Linear(H -> H) + leaky_relu
    h = jnp.dot(h.astype(w2_ref.dtype), w2_ref[...],
                preferred_element_type=jnp.float32) + b2_ref[...]
    h = jnp.maximum(h, LEAKY_SLOPE * h)

    # fused output layer: columns are [mu (ga) | log_std (ga)]
    o = jnp.dot(h.astype(w3_ref.dtype), w3_ref[...],
                preferred_element_type=jnp.float32) + b3_ref[...]     # (tile, 2*ga) f32

    # TanhGaussian: squash log_std into [LOG_STD_LOW, LOG_STD_HIGH], then exp.
    # Applied via a lane mask (no mid-vreg slicing); the tanh/exp on the mu half is
    # discarded EUP filler (EUP slot is otherwise idle), and tanh bounds exp's input.
    squashed = jnp.exp(LOG_STD_LOW + 0.5 * (LOG_STD_HIGH - LOG_STD_LOW)
                       * (jnp.tanh(o) + 1.0))
    col = jax.lax.broadcasted_iota(jnp.int32, o.shape, 1)
    out_ref[...] = jnp.where(col >= ga, squashed, o)


def _choose_tile_b(n_rows, max_tile=1024, min_tile=256):
    """Row-tile: as large as useful, >=2 grid steps when possible (v7x megacore),
    clamped for tiny inputs; always a multiple of the 8-row sublane."""
    half = (n_rows // 2) // min_tile * min_tile
    t = min(max_tile, max(min_tile, half))
    rows_needed = pl.cdiv(n_rows, 8) * 8
    return max(8, min(t, rows_needed))


def actor_forward(state, params, *, num_gammas, action_dim, tile_b=None):
    """state: (B, L, state_dim) float32.  Returns (mu, std), each (B, L, G, A)."""
    B, L, D = state.shape
    w1, b1, w2, b2, w3, b3 = params
    H = w1.shape[1]
    GA = num_gammas * action_dim
    assert w3.shape == (H, 2 * GA)

    N = B * L
    if tile_b is None:
        tile_b = _choose_tile_b(N)
    x = state.reshape(N, D)                       # native f32; cast to bf16 in-kernel

    w1b = w1.astype(jnp.bfloat16)
    w2b = w2.astype(jnp.bfloat16)
    w3b = w3.astype(jnp.bfloat16)
    b1f = b1.astype(jnp.float32)
    b2f = b2.astype(jnp.float32)
    b3f = b3.astype(jnp.float32)

    grid = (pl.cdiv(N, tile_b),)                  # ragged last block handled by Pallas

    # Grid-invariant weights: single-buffer them only if they are big enough to
    # threaten the scoped-VMEM defaults (v5e 16 MiB, v6e/v7x 32 MiB).
    weight_bytes = 2 * (D * H + H * H + H * 2 * GA)       # bf16
    big_weights = weight_bytes > (4 << 20)
    if big_weights:
        const = lambda shape: pl.BlockSpec(shape, lambda i: (0, 0),
                                           pipeline_mode=pl.Buffered(1))
    else:
        const = lambda shape: pl.BlockSpec(shape, lambda i: (0, 0))

    cp_kwargs = dict(dimension_semantics=("parallel",))
    if big_weights:
        cp_kwargs["vmem_limit_bytes"] = 64 * 1024 * 1024

    cost = pl.CostEstimate(
        flops=2 * N * (D * H + H * H + H * 2 * GA),
        transcendentals=2 * N * 2 * GA,                      # tanh + exp on (N, 2*GA)
        bytes_accessed=(N * D * 4 + N * 2 * GA * 4
                        + weight_bytes + (2 * H + 2 * GA) * 4),
    )

    out = pl.pallas_call(
        functools.partial(_actor_kernel, ga=GA),
        out_shape=jax.ShapeDtypeStruct((N, 2 * GA), jnp.float32),
        grid=grid,
        in_specs=[
            pl.BlockSpec((tile_b, D), lambda i: (i, 0)),   # x rows (f32)
            const((D, H)), const((1, H)),                  # layer 1
            const((H, H)), const((1, H)),                  # layer 2
            const((H, 2 * GA)), const((1, 2 * GA)),        # fused output layer
        ],
        out_specs=pl.BlockSpec((tile_b, 2 * GA), lambda i: (i, 0)),
        compiler_params=pltpu.CompilerParams(**cp_kwargs),
        cost_estimate=cost,
    )(x, w1b, b1f, w2b, b2f, w3b, b3f)

    mu = out[:, :GA].reshape(B, L, num_gammas, action_dim)
    std = out[:, GA:].reshape(B, L, num_gammas, action_dim)
    return mu, std


def init_actor_params(key, state_dim, action_dim, num_gammas, d_hidden):
    """Deterministic synthetic parameters matching Actor(..., n_layers=2).

    The final projection's columns are permuted once here into [mu cols | log_std cols]
    (the torch layout is interleaved per-gamma: c = g*2A + j, j<A -> mu, j>=A -> log_std),
    so the kernel can use one fused matmul.  If real torch weights are loaded, apply the
    same permutation to the last layer's weight/bias.
    """
    d_output = 2 * action_dim * num_gammas  # TanhGaussian.input_dimension * num_gammas
    ks = jax.random.split(key, 6)
    sc = 0.1
    w1 = sc * jax.random.normal(ks[0], (state_dim, d_hidden), jnp.float32)
    b1 = sc * jax.random.normal(ks[1], (1, d_hidden), jnp.float32)
    w2 = sc * jax.random.normal(ks[2], (d_hidden, d_hidden), jnp.float32)
    b2 = sc * jax.random.normal(ks[3], (1, d_hidden), jnp.float32)
    w3 = sc * jax.random.normal(ks[4], (d_hidden, d_output), jnp.float32)
    b3 = sc * jax.random.normal(ks[5], (1, d_output), jnp.float32)

    A, G = action_dim, num_gammas
    mu_cols = [g * 2 * A + j for g in range(G) for j in range(A)]
    ls_cols = [g * 2 * A + A + j for g in range(G) for j in range(A)]
    perm = jnp.array(mu_cols + ls_cols, jnp.int32)
    w3f, b3f = w3[:, perm], b3[:, perm]
    return (w1, b1, w2, b2, w3f, b3f)


def actor_reference(state, params, *, num_gammas, action_dim):
    """Pure-JAX f32 reference of the same forward pass (for a correctness check)."""
    w1, b1, w2, b2, w3, b3 = params
    GA = num_gammas * action_dim
    lr = lambda v: jnp.where(v > 0, v, LEAKY_SLOPE * v)
    h = lr(state @ w1 + b1[0])
    h = lr(h @ w2 + b2[0])
    o = h @ w3 + b3[0]
    mu, ls = o[..., :GA], o[..., GA:]
    log_std = LOG_STD_LOW + 0.5 * (LOG_STD_HIGH - LOG_STD_LOW) * (jnp.tanh(ls) + 1.0)
    B, L, _ = state.shape
    return (mu.reshape(B, L, num_gammas, action_dim),
            jnp.exp(log_std).reshape(B, L, num_gammas, action_dim))


if __name__ == "__main__":
    # Small, module-consistent shapes.
    B, L = 2, 8               # batch, sequence ('b ...' leading dims)
    state_dim = 32
    action_dim = 4
    num_gammas = 3            # len(gammas)
    d_hidden = 32             # small stand-in for the default 256
    # TODO(synk): the torch module returns a torch.distributions SquashedNormal
    # object; here we return its parameters (mu, std), which fully determine it.

    key = jax.random.PRNGKey(0)
    k_param, k_state = jax.random.split(key)
    params = init_actor_params(k_param, state_dim, action_dim, num_gammas, d_hidden)
    state = jax.random.normal(k_state, (B, L, state_dim), jnp.float32)

    fwd = functools.partial(actor_forward, num_gammas=num_gammas, action_dim=action_dim)
    mu, std = jax.block_until_ready(fwd(state, params))

    mu_ref, std_ref = actor_reference(state, params,
                                      num_gammas=num_gammas, action_dim=action_dim)
    assert mu.shape == (B, L, num_gammas, action_dim)
    assert std.shape == (B, L, num_gammas, action_dim)
    # bf16 MXU inputs with f32 accumulation -> loosened tolerance vs the f32 reference.
    assert jnp.allclose(mu, mu_ref, atol=2e-2, rtol=2e-2)
    assert jnp.allclose(std, std_ref, atol=2e-2, rtol=2e-2)
    assert bool(jnp.isfinite(mu).all()) and bool(jnp.isfinite(std).all())
    print("KERNEL_OK")
</pallas_src>

<mosaic_0001>
module attributes {stable_mosaic.version = 11 : i64} {
  func.func @_actor_kernel(%arg0: i32, %arg1: memref<16x32xf32, #tpu.memory_space<vmem>>, %arg2: memref<32x32xbf16, #tpu.memory_space<vmem>>, %arg3: memref<1x32xf32, #tpu.memory_space<vmem>>, %arg4: memref<32x32xbf16, #tpu.memory_space<vmem>>, %arg5: memref<1x32xf32, #tpu.memory_space<vmem>>, %arg6: memref<32x24xbf16, #tpu.memory_space<vmem>>, %arg7: memref<1x24xf32, #tpu.memory_space<vmem>>, %arg8: memref<16x24xf32, #tpu.memory_space<vmem>>) attributes {dimension_semantics = [#tpu.dimension_semantics<parallel>], iteration_bounds = array<i64: 1>, scalar_prefetch = 0 : i64, scratch_operands = 0 : i64, tpu.core_type = #tpu.core_type<tc>, window_params = [{transform_indices = @transform_0, window_bounds = array<i64: 16, 32>}, {pipeline_mode = #tpu.pipeline_mode<synchronous>, transform_indices = @transform_1, window_bounds = array<i64: 32, 32>}, {pipeline_mode = #tpu.pipeline_mode<synchronous>, transform_indices = @transform_2, window_bounds = array<i64: 1, 32>}, {pipeline_mode = #tpu.pipeline_mode<synchronous>, transform_indices = @transform_3, window_bounds = array<i64: 32, 32>}, {pipeline_mode = #tpu.pipeline_mode<synchronous>, transform_indices = @transform_4, window_bounds = array<i64: 1, 32>}, {pipeline_mode = #tpu.pipeline_mode<synchronous>, transform_indices = @transform_5, window_bounds = array<i64: 32, 24>}, {pipeline_mode = #tpu.pipeline_mode<synchronous>, transform_indices = @transform_6, window_bounds = array<i64: 1, 24>}, {transform_indices = @transform_7, window_bounds = array<i64: 16, 24>}]} {
    %c0 = arith.constant 0 : index
    %c0_0 = arith.constant 0 : index
    %0 = vector.load %arg1[%c0, %c0_0] : memref<16x32xf32, #tpu.memory_space<vmem>>, vector<16x32xf32>
    %1 = arith.truncf %0 : vector<16x32xf32> to vector<16x32xbf16>
    %c0_1 = arith.constant 0 : index
    %c0_2 = arith.constant 0 : index
    %2 = vector.load %arg2[%c0_1, %c0_2] : memref<32x32xbf16, #tpu.memory_space<vmem>>, vector<32x32xbf16>
    %cst = arith.constant dense<0.000000e+00> : vector<16x32xf32>
    %3 = tpu.matmul %1, %2, %cst {dimension_numbers = #tpu.dot_dimension_numbers<[1], [0], [0], [1], [0, 0, 1, 1], [], []>} : vector<16x32xbf16>, vector<32x32xbf16>, vector<16x32xf32> -> vector<16x32xf32>
    %c0_3 = arith.constant 0 : index
    %c0_4 = arith.constant 0 : index
    %4 = vector.load %arg3[%c0_3, %c0_4] : memref<1x32xf32, #tpu.memory_space<vmem>>, vector<1x32xf32>
    %5 = vector.broadcast %4 : vector<1x32xf32> to vector<16x32xf32>
    %6 = arith.addf %3, %5 : vector<16x32xf32>
    %cst_5 = arith.constant 0.00999999977 : f32
    %7 = vector.broadcast %cst_5 : f32 to vector<16x32xf32>
    %8 = arith.mulf %7, %6 : vector<16x32xf32>
    %9 = arith.maximumf %6, %8 : vector<16x32xf32>
    %10 = arith.truncf %9 : vector<16x32xf32> to vector<16x32xbf16>
    %c0_6 = arith.constant 0 : index
    %c0_7 = arith.constant 0 : index
    %11 = vector.load %arg4[%c0_6, %c0_7] : memref<32x32xbf16, #tpu.memory_space<vmem>>, vector<32x32xbf16>
    %cst_8 = arith.constant dense<0.000000e+00> : vector<16x32xf32>
    %12 = tpu.matmul %10, %11, %cst_8 {dimension_numbers = #tpu.dot_dimension_numbers<[1], [0], [0], [1], [0, 0, 1, 1], [], []>} : vector<16x32xbf16>, vector<32x32xbf16>, vector<16x32xf32> -> vector<16x32xf32>
    %c0_9 = arith.constant 0 : index
    %c0_10 = arith.constant 0 : index
    %13 = vector.load %arg5[%c0_9, %c0_10] : memref<1x32xf32, #tpu.memory_space<vmem>>, vector<1x32xf32>
    %14 = vector.broadcast %13 : vector<1x32xf32> to vector<16x32xf32>
    %15 = arith.addf %12, %14 : vector<16x32xf32>
    %cst_11 = arith.constant 0.00999999977 : f32
    %16 = vector.broadcast %cst_11 : f32 to vector<16x32xf32>
    %17 = arith.mulf %16, %15 : vector<16x32xf32>
    %18 = arith.maximumf %15, %17 : vector<16x32xf32>
    %19 = arith.truncf %18 : vector<16x32xf32> to vector<16x32xbf16>
    %c0_12 = arith.constant 0 : index
    %c0_13 = arith.constant 0 : index
    %20 = vector.load %arg6[%c0_12, %c0_13] : memref<32x24xbf16, #tpu.memory_space<vmem>>, vector<32x24xbf16>
    %cst_14 = arith.constant dense<0.000000e+00> : vector<16x24xf32>
    %21 = tpu.matmul %19, %20, %cst_14 {dimension_numbers = #tpu.dot_dimension_numbers<[1], [0], [0], [1], [0, 0, 1, 1], [], []>} : vector<16x32xbf16>, vector<32x24xbf16>, vector<16x24xf32> -> vector<16x24xf32>
    %c0_15 = arith.constant 0 : index
    %c0_16 = arith.constant 0 : index
    %22 = vector.load %arg7[%c0_15, %c0_16] : memref<1x24xf32, #tpu.memory_space<vmem>>, vector<1x24xf32>
    %23 = vector.broadcast %22 : vector<1x24xf32> to vector<16x24xf32>
    %24 = arith.addf %21, %23 : vector<16x24xf32>
    %25 = math.tanh %24 : vector<16x24xf32>
    %cst_17 = arith.constant 1.000000e+00 : f32
    %26 = vector.broadcast %cst_17 : f32 to vector<16x24xf32>
    %27 = arith.addf %25, %26 : vector<16x24xf32>
    %cst_18 = arith.constant 3.500000e+00 : f32
    %28 = vector.broadcast %cst_18 : f32 to vector<16x24xf32>
    %29 = arith.mulf %28, %27 : vector<16x24xf32>
    %cst_19 = arith.constant -5.000000e+00 : f32
    %30 = vector.broadcast %cst_19 : f32 to vector<16x24xf32>
    %31 = arith.addf %30, %29 : vector<16x24xf32>
    %32 = math.exp %31 : vector<16x24xf32>
    %33 = tpu.iota {dimensions = array<i32: 1>} : vector<16x24xi32>
    %c12_i32 = arith.constant 12 : i32
    %34 = vector.broadcast %c12_i32 : i32 to vector<16x24xi32>
    %35 = arith.cmpi sge, %33, %34 : vector<16x24xi32>
    %36 = arith.select %35, %32, %24 : vector<16x24xi1>, vector<16x24xf32>
    %c0_20 = arith.constant 0 : index
    %c0_21 = arith.constant 0 : index
    %37 = vector.load %arg8[%c0_20, %c0_21] : memref<16x24xf32, #tpu.memory_space<vmem>>, vector<16x24xf32>
    tpu.vector_store %arg8[%c0_20, %c0_21], %36 {strides = array<i32>} : memref<16x24xf32, #tpu.memory_space<vmem>>, vector<16x24xf32>,
    return
  }
  func.func @transform_0(%arg0: i32) -> (i32, i32) {
    %c0_i32 = arith.constant 0 : i32
    %c0_i32_0 = arith.constant 0 : i32
    return %arg0, %c0_i32 : i32, i32
  }
  func.func @transform_1(%arg0: i32) -> (i32, i32) {
    %c0_i32 = arith.constant 0 : i32
    %c0_i32_0 = arith.constant 0 : i32
    %c0_i32_1 = arith.constant 0 : i32
    return %c0_i32, %c0_i32_0 : i32, i32
  }
  func.func @transform_2(%arg0: i32) -> (i32, i32) {
    %c0_i32 = arith.constant 0 : i32
    %c0_i32_0 = arith.constant 0 : i32
    %c0_i32_1 = arith.constant 0 : i32
    return %c0_i32, %c0_i32_0 : i32, i32
  }
  func.func @transform_3(%arg0: i32) -> (i32, i32) {
    %c0_i32 = arith.constant 0 : i32
    %c0_i32_0 = arith.constant 0 : i32
    %c0_i32_1 = arith.constant 0 : i32
    return %c0_i32, %c0_i32_0 : i32, i32
  }
  func.func @transform_4(%arg0: i32) -> (i32, i32) {
    %c0_i32 = arith.constant 0 : i32
    %c0_i32_0 = arith.constant 0 : i32
    %c0_i32_1 = arith.constant 0 : i32
    return %c0_i32, %c0_i32_0 : i32, i32
  }
  func.func @transform_5(%arg0: i32) -> (i32, i32) {
    %c0_i32 = arith.constant 0 : i32
    %c0_i32_0 = arith.constant 0 : i32
    %c0_i32_1 = arith.constant 0 : i32
    return %c0_i32, %c0_i32_0 : i32, i32
  }
  func.func @transform_6(%arg0: i32) -> (i32, i32) {
    %c0_i32 = arith.constant 0 : i32
    %c0_i32_0 = arith.constant 0 : i32
    %c0_i32_1 = arith.constant 0 : i32
    return %c0_i32, %c0_i32_0 : i32, i32
  }
  func.func @transform_7(%arg0: i32) -> (i32, i32) {
    %c0_i32 = arith.constant 0 : i32
    %c0_i32_0 = arith.constant 0 : i32
    return %arg0, %c0_i32 : i32, i32
  }
}

</mosaic_0001>

<bundles_post_ra>
// kernel: tpu_custom_call.1
= control target key start
LH: loop header
LB: loop body
LE: loop exit
PB: predicated region body
PF: predicated region fallthrough
CT: control target
= control target key end

     0   :  { %12 = vsyncpa [#allocation3], 0  ;;  %s511_s0 = inlined_call_operand.vmem [shape: f32[16,32], index: 0, kind: input, shape index: {}]   ;;  %s512_s1 = inlined_call_operand.hbm [shape: bf16[32,32], index: 1, kind: input, shape index: {}]   ;;  %s513_s2 = inlined_call_operand.vmem [shape: f32[1,32], index: 2, kind: input, shape index: {}]   ;;  %s514_s3 = inlined_call_operand.vmem [shape: bf16[32,32], index: 3, kind: input, shape index: {}]   ;;  %s515_s4 = inlined_call_operand.vmem [shape: f32[1,32], index: 4, kind: input, shape index: {}]   ;;  %s516_s5 = inlined_call_operand.vmem [shape: bf16[32,24], index: 5, kind: input, shape index: {}]   ;;  %s517_s6 = inlined_call_operand.vmem [shape: f32[1,24], index: 6, kind: input, shape index: {}]   ;;  %s518_s7 = inlined_call_operand.hbm [shape: f32[16,24], index: 7, kind: output, shape index: {}]  }
   0x1   :  { %13 = vsyncpa [#allocation4], 0  ;;  %s409_s24 = smov [#allocation2]   ;;  %s361_s28 = scalar_lea.hbm %s512_s1, 256 }
   0x2   :  { %s21_s25 = sshll.u32 %s409_s24, 4  ;;  %p362_p0 = scmp.ne.s32.totalorder %s512_s1, %s361_s28  ;;  %s22_s25 = int_to_ptr.vmem [resolvable:$true] %s21_s25 }
   0x3   :  { %p365_p1 = scmp.lt.u32.totalorder %s361_s28, %s512_s1 }
   0x5   :  { %p367_p2 = pnand %p365_p1, %p362_p0 }
   0x7   :  { %370 = shalt.err (!%p367_p2)
}
   0x8   :  { %s371_s10 = scalar_lea.vmem %s22_s25, 256  ;;  %p376_p4 = scmp.lt.s32.totalorder %s22_s25, %s22_s25 }
   0x9   :  { %p372_p3 = scmp.ne.s32.totalorder %s22_s25, %s371_s10  ;;  %p377_p5 = scmp.lt.s32.totalorder %s371_s10, %s371_s10 }
   0xb   :  { %p378_p6 = por %p377_p5, %p376_p4 }
   0xd   :  { %p379_p7 = pnand %p378_p6, %p372_p3 }
   0xf   :  { %382 = shalt.err (!%p379_p7)
}
  0x10   :  { %s410_s11 = smov 64   ;;  %s411_s12 = smov 4  }
  0x11   :  { %27 = dma.hbm_to_vmem [thread:$0]  %s512_s1, 256, %s22_s25, [#allocation3], %s410_s11, %s410_s11, %s411_s12  }
  0x12   :  { %405 = dma.done.wait [#allocation3], 256  }
  0x13   :  { %406 = vsyncadd [#allocation3], 4294967040  ;;  %v412_v0 = vmov 0.0   ;;  %vm413_vm0 = vmmov 0   ;;  %v347_v1 = vld [vmem:[#allocation2] sm:$0xff]   ;;  %v348_v2 = vld [vmem:[#allocation2 + $0x8] sm:$0xff]   ;;  %v269_v50 = vlaneseq }
  0x14   :  { %315 = vmatprep.subr.bf16.mxu0 %v412_v0  ;;  %319 = vmatprep.mubr.msk.bf16.mxu0 %vm413_vm0, %v412_v0  ;;  %v42_v3 = vld [vmem:[%s511_s0] sm:$0xff]  ;;  %v43_v4 = vld [vmem:[%s511_s0 + $0x8] sm:$0xff]  ;;  %vm68_vm1 = vcmask 261120   ;;  %vm274_vm3 = vcmask 195584  }
  0x15   :  { %323 = vmatprep.subr.bf16.mxu1 %v412_v0  ;;  %327 = vmatprep.mubr.msk.bf16.mxu1 %vm413_vm0, %v412_v0  ;;  %v44_v5 = vpack.c.bf16 %v43_v4, %v42_v3  ;;  %v349_v6 = vld [vmem:[%s514_s3] sm:$0xff]   ;;  %v350_v7 = vld [vmem:[%s514_s3 + $0x8] sm:$0xff]   ;;  %v270_v52 = vand.u32 127, %v269_v50 }
  0x16   :  { %316 = vmatpush3.bf16.msra.mxu0 %v347_v1  ;;  %324 = vmatpush3.bf16.msra.mxu1 %v349_v6  ;;  %v294_v8 = vld [vmem:[%s513_s2] ss:$0 sm:$0xff]  ;;  %v352_v21 = vld [vmem:[%s516_s5 + $0x8] sm:$0xff]  }
  0x17   :  { %317 = vmatprep.subr.bf16.mxu0 %v412_v0  ;;  %325 = vmatprep.subr.bf16.mxu1 %v412_v0  ;;  %v351_v20 = vld [vmem:[%s516_s5] sm:$0xff]   ;;  %vm271_vm2 = vcmp.ge.s32.totalorder %v270_v52, 12 }
  0x18   :  { %v298_v22 = vld [vmem:[%s515_s4] ss:$0 sm:$0xff]  ;;  %s414_s4 = smov [#allocation5]  }
  0x19   :  { %v302_v34 = vld [vmem:[%s517_s6] ss:$0 sm:$0xff]  ;;  %s282_s6 = sshll.u32 %s414_s4, 4  ;;  %s283_s6 = int_to_ptr.vmem [resolvable:$true] %s282_s6 }
  0x1a   :  { %318 = vmatpush3.bf16.msra.mxu0 %v348_v2  ;;  %326 = vmatpush3.bf16.msra.mxu1 %v350_v7  ;;  %s383_s28 = scalar_lea.vmem %s283_s6, 256  ;;  %p388_p9 = scmp.lt.s32.totalorder %s283_s6, %s283_s6 }
  0x1b   :  { %331 = vmatprep.subr.bf16.mxu0 %v412_v0  ;;  %p384_p8 = scmp.ne.s32.totalorder %s283_s6, %s383_s28  ;;  %p389_p10 = scmp.lt.s32.totalorder %s383_s28, %s383_s28 }
  0x1d   :  { %320 = vmatmul.mubr.msk.bf16.vlgmr.msra.gmra.mrb[0].mxu0 %vm68_vm1, %v44_v5  ;;  %p390_p11 = por %p389_p10, %p388_p9 }
  0x1e   :  { %335 = vmatprep.mubr.msk.bf16.mxu0 %vm413_vm0, %v412_v0  ;;  %332 = vmatpush3.bf16.msra.mxu0 %v351_v20 }
  0x1f   :  { %333 = vmatprep.subr.bf16.mxu0 %v412_v0  ;;  %p391_p12 = pnand %p390_p11, %p384_p8 }
  0x22   :  { %334 = vmatpush3.bf16.msra.mxu0 %v352_v21 }
  0xf0   :  { %v106_v9 = vpop.f32.mrb[0].mxu0 }
  0xf1   :  { %v107_v10 = vadd.f32 %v294_v8, %v106_v9  ;;  %v321_v11 = vpop.f32.mrb[1].mxu0 }
  0xf2   :  { %v109_v12 = vpop.f32.mrb[2].mxu0 }
  0xf3   :  { %v113_v13 = vmul.f32 0.01, %v107_v10  ;;  %v110_v14 = vadd.f32 %v294_v8, %v109_v12  ;;  %v322_v15 = vpop.f32.mrb[3].mxu0 }
  0xf5   :  { %v114_v16 = vmul.f32 0.01, %v110_v14  ;;  %v115_v17 = vmax.f32 %v107_v10, %v113_v13 }
  0xf7   :  { %v116_v18 = vmax.f32 %v110_v14, %v114_v16 }
  0xf9   :  { %v117_v19 = vpack.c.bf16 %v116_v18, %v115_v17 }
  0xfb   :  { %328 = vmatmul.mubr.msk.bf16.vlgmr.msra.gmra.mrb[0].mxu1 %vm68_vm1, %v117_v19 }
 0x1ce   :  { %v178_v23 = vpop.f32.mrb[0].mxu1 }
 0x1cf   :  { %v179_v24 = vadd.f32 %v298_v22, %v178_v23  ;;  %v329_v25 = vpop.f32.mrb[1].mxu1 }
 0x1d0   :  { %v181_v26 = vpop.f32.mrb[2].mxu1 }
 0x1d1   :  { %v185_v27 = vmul.f32 0.01, %v179_v24  ;;  %v182_v28 = vadd.f32 %v298_v22, %v181_v26  ;;  %v330_v29 = vpop.f32.mrb[3].mxu1 }
 0x1d3   :  { %v186_v30 = vmul.f32 0.01, %v182_v28  ;;  %v187_v31 = vmax.f32 %v179_v24, %v185_v27 }
 0x1d5   :  { %v188_v32 = vmax.f32 %v182_v28, %v186_v30 }
 0x1d7   :  { %v189_v33 = vpack.c.bf16 %v188_v32, %v187_v31 }
 0x1d9   :  { %336 = vmatmul.mubr.msk.bf16.vlgmr.msra.gmra.mrb[4].mxu0 %vm68_vm1, %v189_v33 }
 0x2ac   :  { %v250_v35 = vpop.f32.mrb[4].mxu0 }
 0x2ad   :  { %v251_v36 = vadd.f32 %v302_v34, %v250_v35  ;;  %v337_v37 = vpop.f32.mrb[5].mxu0 }
 0x2ae   :  { %v253_v38 = vpop.f32.mrb[6].mxu0 }
 0x2af   :  { %353 = vtanh.f32 %v251_v36  ;;  %v254_v39 = vadd.f32 %v302_v34, %v253_v38  ;;  %v338_v40 = vpop.f32.mrb[7].mxu0 }
 0x2b1   :  { %355 = vtanh.f32 %v254_v39 }
 0x2b9   :  { %v354_v41 = vpop.eup %353 }
 0x2ba   :  { %v259_v42 = vadd.f32 1.0, %v354_v41 }
 0x2bb   :  { %v356_v43 = vpop.eup %355 }
 0x2bc   :  { %v261_v44 = vmul.f32 3.5, %v259_v42  ;;  %v260_v45 = vadd.f32 1.0, %v356_v43 }
 0x2be   :  { %v263_v46 = vadd.f32 -5.0, %v261_v44  ;;  %v262_v47 = vmul.f32 3.5, %v260_v45 }
 0x2c0   :  { %v265_v48 = vmul.f32 1.442695, %v263_v46  ;;  %v264_v49 = vadd.f32 -5.0, %v262_v47 }
 0x2c2   :  { %357 = vpow2.f32 %v265_v48  ;;  %v267_v51 = vmul.f32 1.442695, %v264_v49 }
 0x2c4   :  { %359 = vpow2.f32 %v267_v51 }
 0x2cc   :  { %v358_v53 = vpop.eup %357 }
 0x2cd   :  { %v272_v54 = vsel %vm271_vm2, %v358_v53, %v251_v36 }
 0x2ce   :  { %v360_v55 = vpop.eup %359  ;;  %275 = vst.msk [vmem:[#allocation5] sm:$0xff] %vm274_vm3, %v272_v54 }
 0x2cf   :  { %v273_v56 = vsel %vm271_vm2, %v360_v55, %v254_v39 }
 0x2d0   :  { %276 = vst.msk [vmem:[#allocation5 + $0x8] sm:$0xff] %vm274_vm3, %v273_v56 }
 0x2d1   :  { %394 = shalt.err (!%p391_p12)
}
 0x2d2   :  { %s395_s8 = scalar_lea.hbm %s518_s7, 256 }
 0x2d3   :  { %p396_p13 = scmp.ne.s32.totalorder %s518_s7, %s395_s8  ;;  %p399_p0 = scmp.lt.u32.totalorder %s395_s8, %s518_s7 }
 0x2d5   :  { %p401_p1 = pnand %p399_p0, %p396_p13 }
 0x2d7   :  { %404 = shalt.err (!%p401_p1)
}
 0x2d8   :  { %s415_s13 = smov 128   ;;  %s416_s14 = smov 8  }
 0x2d9   :  { %288 = dma.vmem_to_hbm [thread:$0]  %s283_s6, 256, %s518_s7, [#allocation4], %s415_s13, %s415_s13, %s416_s14  }
 0x2da   :  { %407 = dma.done.wait [#allocation4], 256  }
 0x2db   :  { %408 = vsyncadd [#allocation4], 4294967040 }
 0x2dc   :  { %292 = vsyncpa [#allocation3], 1 }
 0x2dd   :  { %293 = vsyncpa [#allocation4], 1 }

</bundles_post_ra>
